<compile_context>
chip_gen: v7x
topology: tpu7x:2x2x1
jax: 0.10.0
libtpu: 0.0.40
codegen_flags: <defaults>
</compile_context>

<pallas_src>
import functools

import jax
import jax.numpy as jnp
from jax import lax
from jax.experimental import pallas as pl
from jax.experimental.pallas import tpu as pltpu


def _round_up(a, m):
    return -(-a // m) * m


def _vmem_capacity_bytes():
    try:
        return int(pltpu.get_tpu_info().vmem_capacity_bytes)
    except Exception:
        return 64 << 20  # conservative fallback (v7x per-TC VMEM)


def _pick_tb(B, hid, cap):
    """Default batch tile: big on 128-MiB parts, >=2 grid steps when possible."""
    pref = 512 if cap >= (96 << 20) else 256
    # Keep the f32 (+bf16 copy) activation temporaries comfortably inside VMEM.
    while pref > 128 and hid * pref * 12 > cap // 3:
        pref //= 2
    tb = min(pref, _round_up(max(B, 1), 128))
    # v7x has 2 TensorCores: prefer >=2 grid steps when the batch allows it.
    while tb > 128 and B > 128 and (-(-B // tb)) < 2:
        tb //= 2
    return tb


# ---------------------------------------------------------------------------
# Kernels
# ---------------------------------------------------------------------------

def _mlp_kernel_fm(xT_ref, w1_ref, w2_ref, bias_ref, b3_ref, o_ref, *, mxu_dtype):
    """Feature-major: activations are [feat, batch]; batch lives on lanes."""
    b1 = bias_ref[:, 0:1]                     # [hid, 1] f32
    b2 = bias_ref[:, 1:2]                     # [hid, 1] f32
    w3 = bias_ref[:, 2:3]                     # [hid, 1] f32

    xT = xT_ref[...].astype(mxu_dtype)        # [d, tb]

    # layer 1: [hid, d] @ [d, tb] -> [hid, tb], f32 accumulate.
    h1 = jnp.dot(w1_ref[...], xT, preferred_element_type=jnp.float32)
    h1 = jnp.maximum(h1 + b1, 0.0)

    # layer 2: [hid, hid] @ [hid, tb] -> [hid, tb].
    h2 = jnp.dot(w2_ref[...], h1.astype(mxu_dtype),
                 preferred_element_type=jnp.float32)
    h2 = jnp.maximum(h2 + b2, 0.0)

    # layer 3 (hid -> 1): VPU multiply + sublane reduce -> lane-dense [1, tb].
    out = jnp.sum(h2 * w3, axis=0, keepdims=True) + b3_ref[0]
    o_ref[...] = out.astype(o_ref.dtype)


def _mlp_kernel_bm(x_ref, w1_ref, w2_ref, bias_ref, b3_ref, o_ref, *, mxu_dtype):
    """Batch-major: x tile is [tb, d]; no wrapper transpose over x."""
    b1 = bias_ref[0:1, :]                     # [1, hid] f32
    b2 = bias_ref[1:2, :]                     # [1, hid] f32
    w3 = bias_ref[2:3, :]                     # [1, hid] f32

    x = x_ref[...].astype(mxu_dtype)          # [tb, d]

    # layer 1: contract on d: [tb, d] x [hid, d] -> [tb, hid] (x @ w1^T).
    h1 = lax.dot_general(x, w1_ref[...], (((1,), (1,)), ((), ())),
                         preferred_element_type=jnp.float32)
    h1 = jnp.maximum(h1 + b1, 0.0)

    # layer 2: [tb, hid] x [hid, hid] -> [tb, hid] (h1 @ w2^T).
    h2 = lax.dot_general(h1.astype(mxu_dtype), w2_ref[...],
                         (((1,), (1,)), ((), ())),
                         preferred_element_type=jnp.float32)
    h2 = jnp.maximum(h2 + b2, 0.0)

    # layer 3 (hid -> 1): multiply + lane reduce -> [tb, 1].
    out = jnp.sum(h2 * w3, axis=1, keepdims=True) + b3_ref[0]
    o_ref[...] = out.astype(o_ref.dtype)


# ---------------------------------------------------------------------------
# Wrapper
# ---------------------------------------------------------------------------

@functools.partial(jax.jit, static_argnames=("tb", "mxu_dtype"))
def base_mlp_forward(x, w1, b1, w2, b2, w3, b3, *, tb=None,
                     mxu_dtype=jnp.bfloat16):
    """x: [B, d] f32.  Weights in PyTorch layout (w: [out, in]).  Returns [B, 1] f32."""
    B, d = x.shape
    hid = w1.shape[0]
    mxu = jnp.dtype(mxu_dtype)

    cap = _vmem_capacity_bytes()
    if tb is None:
        tb = _pick_tb(B, hid, cap)
    assert tb % 128 == 0, "batch tile must be a multiple of 128 (lane width)"

    # Cast weights to the MXU operand dtype once (no per-grid-step casts).
    w1c = w1.astype(mxu)
    w2c = w2.astype(mxu)
    b3s = b3.reshape(1).astype(jnp.float32)

    # VMEM budget: single-buffered resident weights + pipelined x/out tiles +
    # f32 activations (and their mxu-dtype copies) + internal-scratch headroom.
    bpe, bpe_w = 4, mxu.itemsize
    w_resident = (hid * d + hid * hid) * bpe_w + hid * 128 * bpe  # bias pack pads to 128 lanes
    io_tiles = (max(d, 1) * tb + tb) * bpe * 2                    # double-buffered I/O tiles
    act = hid * tb * (bpe + bpe_w) * 2                            # h1, h2 (+ low-precision copies)
    needed = w_resident + io_tiles + act + (8 << 20)
    vmem_limit = int(min(max(needed, 16 << 20), int(cap * 0.85)))

    cparams = pltpu.CompilerParams(dimension_semantics=("parallel",),
                                   vmem_limit_bytes=vmem_limit)
    resident = dict(pipeline_mode=pl.Buffered(1))  # constant-index blocks: 1 buffer

    if d < 128:
        # ---- feature-major: x^T [d, B], batch on lanes, lane-dense output ----
        xT = x.T
        B_pad = _round_up(B, tb)
        if B_pad != B:
            xT = jnp.pad(xT, ((0, 0), (0, B_pad - B)))
        bias_pack = jnp.stack(
            [b1, b2, w3.reshape(hid)], axis=1).astype(jnp.float32)    # [hid, 3]

        out = pl.pallas_call(
            functools.partial(_mlp_kernel_fm, mxu_dtype=mxu),
            out_shape=jax.ShapeDtypeStruct((1, B_pad), jnp.float32),
            grid_spec=pltpu.PrefetchScalarGridSpec(
                num_scalar_prefetch=0,
                grid=(B_pad // tb,),
                in_specs=[
                    pl.BlockSpec((d, tb), lambda i: (0, i)),              # x^T tile
                    pl.BlockSpec((hid, d), lambda i: (0, 0), **resident),  # w1
                    pl.BlockSpec((hid, hid), lambda i: (0, 0), **resident),  # w2
                    pl.BlockSpec((hid, 3), lambda i: (0, 0), **resident),  # [b1|b2|w3]
                    pl.BlockSpec(memory_space=pltpu.MemorySpace.SMEM),    # b3 scalar
                ],
                out_specs=pl.BlockSpec((1, tb), lambda i: (0, i)),        # lane-dense
            ),
            compiler_params=cparams,
        )(xT, w1c, w2c, bias_pack, b3s)
        return out.reshape(B_pad, 1)[:B]

    # ---- batch-major: no wrapper transpose / pad over x ----
    bias_pack = jnp.stack(
        [b1, b2, w3.reshape(hid)], axis=0).astype(jnp.float32)           # [3, hid]

    out = pl.pallas_call(
        functools.partial(_mlp_kernel_bm, mxu_dtype=mxu),
        out_shape=jax.ShapeDtypeStruct((B, 1), jnp.float32),
        grid_spec=pltpu.PrefetchScalarGridSpec(
            num_scalar_prefetch=0,
            grid=(pl.cdiv(B, tb),),                                       # ragged last tile OK
            in_specs=[
                pl.BlockSpec((tb, d), lambda i: (i, 0)),                  # x tile
                pl.BlockSpec((hid, d), lambda i: (0, 0), **resident),     # w1
                pl.BlockSpec((hid, hid), lambda i: (0, 0), **resident),   # w2
                pl.BlockSpec((3, hid), lambda i: (0, 0), **resident),     # [b1;b2;w3]
                pl.BlockSpec(memory_space=pltpu.MemorySpace.SMEM),        # b3 scalar
            ],
            out_specs=pl.BlockSpec((tb, 1), lambda i: (i, 0)),
        ),
        compiler_params=cparams,
    )(x, w1c, w2c, bias_pack, b3s)
    return out


# ---------------------------------------------------------------------------
# Init / reference / demo
# ---------------------------------------------------------------------------

def _xavier_uniform(key, shape, dtype=jnp.float32):
    """nn.init.xavier_uniform_ (gain=1) for PyTorch-layout weight [out, in]."""
    fan_out, fan_in = shape
    a = (6.0 / (fan_in + fan_out)) ** 0.5
    return jax.random.uniform(key, shape, dtype, minval=-a, maxval=a)


def init_params(key, d, hid_dim):
    """Params in PyTorch nn.Linear layout: weight [out, in], bias [out]."""
    k1, k2, k3 = jax.random.split(key, 3)
    w1 = _xavier_uniform(k1, (hid_dim, d))
    b1 = jnp.zeros((hid_dim,), jnp.float32)
    w2 = _xavier_uniform(k2, (hid_dim, hid_dim))
    b2 = jnp.zeros((hid_dim,), jnp.float32)
    w3 = _xavier_uniform(k3, (1, hid_dim))
    b3 = jnp.zeros((1,), jnp.float32)
    return w1, b1, w2, b2, w3, b3


def _reference(x, w1, b1, w2, b2, w3, b3):
    hp = lax.Precision.HIGHEST
    h1 = jnp.maximum(jnp.dot(x, w1.T, precision=hp) + b1, 0.0)
    h2 = jnp.maximum(jnp.dot(h1, w2.T, precision=hp) + b2, 0.0)
    return jnp.dot(h2, w3.T, precision=hp) + b3


if __name__ == "__main__":
    key = jax.random.PRNGKey(0)
    kx, kp, kx2, kp2 = jax.random.split(key, 4)

    # ---- small-d path (feature-major): d=8, hid=32, B=16 ----
    B, d, hid_dim = 16, 8, 32
    x = jax.random.normal(kx, (B, d), jnp.float32)
    params = init_params(kp, d, hid_dim)
    ref = _reference(x, *params)

    out_f32 = jax.block_until_ready(
        base_mlp_forward(x, *params, mxu_dtype=jnp.float32))
    assert out_f32.shape == (B, 1)
    assert jnp.allclose(out_f32, ref, atol=1e-2, rtol=1e-2), "f32 feature-major mismatch"

    out_bf16 = jax.block_until_ready(
        base_mlp_forward(x, *params, mxu_dtype=jnp.bfloat16))
    assert out_bf16.shape == (B, 1)
    assert bool(jnp.all(jnp.isfinite(out_bf16)))
    assert jnp.allclose(out_bf16, ref, atol=1e-1, rtol=1e-1), "bf16 feature-major mismatch"

    # ---- large-d path (batch-major, no wrapper transpose): d=128, hid=64, B=200 ----
    B2, d2, hid2 = 200, 128, 64
    x2 = jax.random.normal(kx2, (B2, d2), jnp.float32)
    params2 = init_params(kp2, d2, hid2)
    ref2 = _reference(x2, *params2)

    out2 = jax.block_until_ready(
        base_mlp_forward(x2, *params2, mxu_dtype=jnp.bfloat16))
    assert out2.shape == (B2, 1)
    assert bool(jnp.all(jnp.isfinite(out2)))
    assert jnp.allclose(out2, ref2, atol=1e-1, rtol=1e-1), "bf16 batch-major mismatch"

    print("KERNEL_OK")
</pallas_src>

<mosaic_0001>
module attributes {stable_mosaic.version = 11 : i64} {
  func.func @_mlp_kernel_fm(%arg0: i32, %arg1: memref<8x128xf32, #tpu.memory_space<vmem>>, %arg2: memref<32x8xf32, #tpu.memory_space<vmem>>, %arg3: memref<32x32xf32, #tpu.memory_space<vmem>>, %arg4: memref<32x3xf32, #tpu.memory_space<vmem>>, %arg5: memref<1xf32, #tpu.memory_space<smem>>, %arg6: memref<1x128xf32, #tpu.memory_space<vmem>>) attributes {dimension_semantics = [#tpu.dimension_semantics<parallel>], iteration_bounds = array<i64: 1>, scalar_prefetch = 0 : i64, scratch_operands = 0 : i64, tpu.core_type = #tpu.core_type<tc>, window_params = [{transform_indices = @transform_0, window_bounds = array<i64: 8, 128>}, {pipeline_mode = #tpu.pipeline_mode<synchronous>, transform_indices = @transform_1, window_bounds = array<i64: 32, 8>}, {pipeline_mode = #tpu.pipeline_mode<synchronous>, transform_indices = @transform_2, window_bounds = array<i64: 32, 32>}, {pipeline_mode = #tpu.pipeline_mode<synchronous>, transform_indices = @transform_3, window_bounds = array<i64: 32, 3>}, {transform_indices = @transform_4, window_bounds = array<i64: 1>}, {transform_indices = @transform_5, window_bounds = array<i64: 1, 128>}]} {
    %c0 = arith.constant 0 : index
    %c0_0 = arith.constant 0 : index
    %0 = vector.load %arg4[%c0, %c0_0] : memref<32x3xf32, #tpu.memory_space<vmem>>, vector<32x1xf32>
    %c0_1 = arith.constant 0 : index
    %c1 = arith.constant 1 : index
    %1 = vector.load %arg4[%c0_1, %c1] : memref<32x3xf32, #tpu.memory_space<vmem>>, vector<32x1xf32>
    %c0_2 = arith.constant 0 : index
    %c2 = arith.constant 2 : index
    %2 = vector.load %arg4[%c0_2, %c2] : memref<32x3xf32, #tpu.memory_space<vmem>>, vector<32x1xf32>
    %c0_3 = arith.constant 0 : index
    %c0_4 = arith.constant 0 : index
    %3 = vector.load %arg1[%c0_3, %c0_4] : memref<8x128xf32, #tpu.memory_space<vmem>>, vector<8x128xf32>
    %c0_5 = arith.constant 0 : index
    %c0_6 = arith.constant 0 : index
    %4 = vector.load %arg2[%c0_5, %c0_6] : memref<32x8xf32, #tpu.memory_space<vmem>>, vector<32x8xf32>
    %cst = arith.constant dense<0.000000e+00> : vector<32x128xf32>
    %5 = tpu.matmul %4, %3, %cst {dimension_numbers = #tpu.dot_dimension_numbers<[1], [0], [0], [1], [0, 0, 1, 1], [], []>} : vector<32x8xf32>, vector<8x128xf32>, vector<32x128xf32> -> vector<32x128xf32>
    %6 = vector.broadcast %0 : vector<32x1xf32> to vector<32x128xf32>
    %7 = arith.addf %5, %6 : vector<32x128xf32>
    %cst_7 = arith.constant 0.000000e+00 : f32
    %8 = vector.broadcast %cst_7 : f32 to vector<32x128xf32>
    %9 = arith.maximumf %7, %8 : vector<32x128xf32>
    %c0_8 = arith.constant 0 : index
    %c0_9 = arith.constant 0 : index
    %10 = vector.load %arg3[%c0_8, %c0_9] : memref<32x32xf32, #tpu.memory_space<vmem>>, vector<32x32xf32>
    %cst_10 = arith.constant dense<0.000000e+00> : vector<32x128xf32>
    %11 = tpu.matmul %10, %9, %cst_10 {dimension_numbers = #tpu.dot_dimension_numbers<[1], [0], [0], [1], [0, 0, 1, 1], [], []>} : vector<32x32xf32>, vector<32x128xf32>, vector<32x128xf32> -> vector<32x128xf32>
    %12 = vector.broadcast %1 : vector<32x1xf32> to vector<32x128xf32>
    %13 = arith.addf %11, %12 : vector<32x128xf32>
    %cst_11 = arith.constant 0.000000e+00 : f32
    %14 = vector.broadcast %cst_11 : f32 to vector<32x128xf32>
    %15 = arith.maximumf %13, %14 : vector<32x128xf32>
    %16 = vector.broadcast %2 : vector<32x1xf32> to vector<32x128xf32>
    %17 = arith.mulf %15, %16 : vector<32x128xf32>
    %cst_12 = arith.constant dense<0.000000e+00> : vector<128xf32>
    %18 = vector.multi_reduction <add>, %17, %cst_12 [0] : vector<32x128xf32> to vector<128xf32>
    %19 = vector.shape_cast %18 : vector<128xf32> to vector<1x128xf32>
    %c0_13 = arith.constant 0 : index
    %20 = memref.load %arg5[%c0_13] : memref<1xf32, #tpu.memory_space<smem>>
    %21 = vector.broadcast %20 : f32 to vector<1x128xf32>
    %22 = arith.addf %19, %21 : vector<1x128xf32>
    %c0_14 = arith.constant 0 : index
    %c0_15 = arith.constant 0 : index
    %23 = vector.load %arg6[%c0_14, %c0_15] : memref<1x128xf32, #tpu.memory_space<vmem>>, vector<1x128xf32>
    tpu.vector_store %arg6[%c0_14, %c0_15], %22 {strides = array<i32>} : memref<1x128xf32, #tpu.memory_space<vmem>>, vector<1x128xf32>,
    return
  }
  func.func @transform_0(%arg0: i32) -> (i32, i32) {
    %c0_i32 = arith.constant 0 : i32
    %c0_i32_0 = arith.constant 0 : i32
    return %c0_i32, %arg0 : i32, i32
  }
  func.func @transform_1(%arg0: i32) -> (i32, i32) {
    %c0_i32 = arith.constant 0 : i32
    %c0_i32_0 = arith.constant 0 : i32
    %c0_i32_1 = arith.constant 0 : i32
    return %c0_i32, %c0_i32_0 : i32, i32
  }
  func.func @transform_2(%arg0: i32) -> (i32, i32) {
    %c0_i32 = arith.constant 0 : i32
    %c0_i32_0 = arith.constant 0 : i32
    %c0_i32_1 = arith.constant 0 : i32
    return %c0_i32, %c0_i32_0 : i32, i32
  }
  func.func @transform_3(%arg0: i32) -> (i32, i32) {
    %c0_i32 = arith.constant 0 : i32
    %c0_i32_0 = arith.constant 0 : i32
    %c0_i32_1 = arith.constant 0 : i32
    return %c0_i32, %c0_i32_0 : i32, i32
  }
  func.func @transform_4(%arg0: i32) -> i32 {
    %c0_i32 = arith.constant 0 : i32
    %c0_i32_0 = arith.constant 0 : i32
    return %c0_i32 : i32
  }
  func.func @transform_5(%arg0: i32) -> (i32, i32) {
    %c0_i32 = arith.constant 0 : i32
    %c0_i32_0 = arith.constant 0 : i32
    return %c0_i32, %arg0 : i32, i32
  }
}

</mosaic_0001>

<bundles_post_ra>
// kernel: base_mlp_forward.1
= control target key start
LH: loop header
LB: loop body
LE: loop exit
PB: predicated region body
PF: predicated region fallthrough
CT: control target
= control target key end

     0   :  { %vm50_vm0 = vcmask 64512   ;;  %v375_v3 = vmov 0   ;;  %vm172_vm1 = vcmask 261120   ;;  %v376_v12 = vmov 1   ;;  %s461_s0 = inlined_call_operand.vmem [shape: f32[8,128], index: 0, kind: input, shape index: {}]   ;;  %s462_s1 = inlined_call_operand.vmem [shape: f32[32,8], index: 1, kind: input, shape index: {}]   ;;  %s463_s3 = inlined_call_operand.vmem [shape: f32[32,3], index: 3, kind: input, shape index: {}]   ;;  %s464_s2 = inlined_call_operand.vmem [shape: f32[32,32], index: 2, kind: input, shape index: {}]   ;;  %s465_s4 = inlined_call_operand.<no memory space> [shape: f32[1], index: 4, kind: input, shape index: {}]   ;;  %s466_s5 = inlined_call_operand.vmem [shape: f32[1,128], index: 5, kind: output, shape index: {}]  }
   0x1   :  { %v25_v0 = vld [vmem:[%s461_s0] sm:$0xff]  ;;  %v27_v2 = vld [vmem:[%s462_s1 + $0x8] sm:$0xff]  ;;  %369 = vset.pattern.permute.xlu0 %v375_v3  ;;  %370 = vset.pattern.permute.xlu1 %v375_v3  ;;  %v28_v4 = vld [vmem:[%s462_s1 + $0x10] sm:$0xff]  ;;  %v377_v13 = vmov 2  }
   0x2   :  { %v26_v1 = vld [vmem:[%s462_s1] sm:$0xff]  ;;  %332 = vmatprep.subr.mxu0 %v25_v0  ;;  %v23_v6 = vld [vmem:[%s463_s3 + $0x10] sm:$0xff]  ;;  %v22_v7 = vld [vmem:[%s463_s3 + $0x8] sm:$0xff] }
   0x3   :  { %334 = vmatprep.mubr.msk.f32.mxu0 %vm50_vm0, %v26_v1  ;;  %v21_v5 = vld [vmem:[%s463_s3] sm:$0xff]  ;;  %333 = vmatpush3.msra.mxu0 %v25_v0  ;;  %v29_v8 = vld [vmem:[%s462_s1 + $0x18] sm:$0xff]  ;;  %v154_v11 = vld [vmem:[%s464_s2 + $0x10] sm:$0xff] }
   0x4   :  { %32 = vperm.xlu0 %369, %v21_v5   ;;  %335 = vmatmul.mubr.msk.f32.vlgmr.msra.gmra.mrb[0].mxu0 %vm50_vm0, %v27_v2  ;;  %v24_v9 = vld [vmem:[%s463_s3 + $0x18] sm:$0xff]  ;;  %v152_v10 = vld [vmem:[%s464_s2] sm:$0xff]  ;;  %v153_v32 = vld [vmem:[%s464_s2 + $0x8] sm:$0xff]  ;;  %v304_v2 = vstv %s465_s4 }
   0x5   :  { %42 = vperm.xlu1 %370, %v23_v6   ;;  %337 = vmatprep.mubr.msk.f32.mxu0 %vm50_vm0, %v28_v4  ;;  %v155_v33 = vld [vmem:[%s464_s2 + $0x18] sm:$0xff] }
   0x6   :  { %351 = vmatprep.mubr.msk.f32.mxu1 %vm172_vm1, %v154_v11 }
   0x8   :  { %37 = vperm.xlu0 %369, %v22_v7   ;;  %338 = vmatmul.mubr.msk.f32.gmra.mrb[2].mxu0 %vm50_vm0, %v29_v8 }
   0x9   :  { %47 = vperm.xlu1 %370, %v24_v9   ;;  %348 = vmatprep.mubr.msk.f32.mxu0 %vm172_vm1, %v152_v10 }
   0xc   :  { %371 = vset.pattern.permute.xlu0 %v376_v12 }
   0xd   :  { %372 = vset.pattern.permute.xlu1 %v376_v12  ;;  %157 = vperm.xlu0 %371, %v21_v5  }
   0xe   :  { %161 = vperm.xlu1 %372, %v22_v7  }
  0x11   :  { %169 = vperm.xlu0 %371, %v24_v9  }
  0x12   :  { %165 = vperm.xlu1 %372, %v23_v6  }
  0x15   :  { %374 = vset.pattern.permute.xlu0 %v377_v13 }
  0x16   :  { %373 = vset.pattern.permute.xlu1 %v377_v13  ;;  %279 = vperm.xlu0 %374, %v22_v7  }
  0x17   :  { %275 = vperm.xlu1 %373, %v21_v5  }
  0x1b   :  { %283 = vperm.xlu1 %373, %v23_v6  }
  0x1f   :  { %287 = vperm.xlu1 %373, %v24_v9  }
  0x83   :  { %v33_v14 = vpop.permute.xlu0 %32 }
  0x84   :  { %v43_v15 = vpop.permute.xlu1 %42 }
  0x87   :  { %v38_v16 = vpop.permute.xlu0 %37 }
  0x88   :  { %v48_v22 = vpop.permute.xlu1 %47 }
  0x8c   :  { %v158_v36 = vpop.permute.xlu0 %157 }
  0x8d   :  { %v162_v34 = vpop.permute.xlu1 %161 }
  0x90   :  { %v170_v38 = vpop.permute.xlu0 %169 }
  0x91   :  { %v166_v35 = vpop.permute.xlu1 %165 }
  0x95   :  { %v280_v47 = vpop.permute.xlu0 %279 }
  0x96   :  { %v276_v37 = vpop.permute.xlu1 %275 }
  0x9a   :  { %v284_v48 = vpop.permute.xlu1 %283 }
  0x9e   :  { %v288_v57 = vpop.permute.xlu1 %287 }
  0xd7   :  { %v336_v17 = vpop.f32.mrb[0].mxu0 }
  0xd8   :  { %v135_v18 = vadd.f32 %v336_v17, %v38_v16  ;;  %v129_v19 = vpop.f32.mrb[1].mxu0 }
  0xd9   :  { %v130_v20 = vadd.f32 %v129_v19, %v33_v14 }
  0xda   :  { %v149_v21 = vmax.f32 %v135_v18, 0.0 }
  0xdb   :  { %v148_v23 = vmax.f32 %v130_v20, 0.0  ;;  %v339_v24 = vpop.f32.mrb[2].mxu0 }
  0xdc   :  { %v145_v25 = vadd.f32 %v339_v24, %v48_v22  ;;  %v139_v26 = vpop.f32.mrb[3].mxu0 }
  0xdd   :  { %v354_v27 = vpack.c.bf16 %v149_v21, %v148_v23  ;;  %v140_v28 = vadd.f32 %v139_v26, %v43_v15 }
  0xde   :  { %v151_v29 = vmax.f32 %v145_v25, 0.0 }
  0xdf   :  { %v150_v30 = vmax.f32 %v140_v28, 0.0  ;;  %355 = vmatprep.subr.bf16.mxu0 %v354_v27  ;;  %362 = vmatprep.subr.bf16.mxu1 %v354_v27 }
  0xe0   :  { %357 = vmatpush3.bf16.msra.mxu0 %v354_v27  ;;  %364 = vmatpush3.bf16.msra.mxu1 %v354_v27 }
  0xe1   :  { %v358_v31 = vpack.c.bf16 %v151_v29, %v150_v30 }
  0xe3   :  { %359 = vmatprep.subr.bf16.mxu0 %v358_v31  ;;  %363 = vmatprep.subr.bf16.mxu1 %v358_v31 }
  0xe4   :  { %361 = vmatpush3.bf16.msra.mxu0 %v358_v31  ;;  %365 = vmatpush3.bf16.msra.mxu1 %v358_v31 }
  0xe7   :  { %349 = vmatmul.mubr.msk.f32.vlgmr.msra.gmra.mrb[4].mxu0 %vm172_vm1, %v153_v32  ;;  %352 = vmatmul.mubr.msk.f32.vlgmr.msra.gmra.mrb[0].mxu1 %vm172_vm1, %v155_v33 }
 0x1ba   :  { %v350_v39 = vpop.f32.mrb[4].mxu0  ;;  %v353_v40 = vpop.f32.mrb[0].mxu1 }
 0x1bb   :  { %v257_v41 = vadd.f32 %v350_v39, %v162_v34  ;;  %v251_v42 = vpop.f32.mrb[5].mxu0  ;;  %v261_v43 = vpop.f32.mrb[1].mxu1  ;;  %v267_v44 = vadd.f32 %v353_v40, %v170_v38 }
 0x1bc   :  { %v252_v45 = vadd.f32 %v251_v42, %v158_v36  ;;  %v262_v46 = vadd.f32 %v261_v43, %v166_v35 }
 0x1bd   :  { %v271_v49 = vmax.f32 %v257_v41, 0.0  ;;  %v273_v53 = vmax.f32 %v267_v44, 0.0 }
 0x1be   :  { %v270_v50 = vmax.f32 %v252_v45, 0.0  ;;  %v272_v51 = vmax.f32 %v262_v46, 0.0 }
 0x1bf   :  { %v291_v52 = vmul.f32 %v280_v47, %v271_v49  ;;  %v293_v58 = vmul.f32 %v288_v57, %v273_v53 }
 0x1c0   :  { %v290_v54 = vmul.f32 %v276_v37, %v270_v50  ;;  %v292_v55 = vmul.f32 %v284_v48, %v272_v51 }
 0x1c2   :  { %v294_v56 = vadd.f32 %v291_v52, %v290_v54 }
 0x1c4   :  { %v295_v59 = vadd.f32 %v294_v56, %v292_v55 }
 0x1c6   :  { %v296_v60 = vadd.f32 %v295_v59, %v293_v58 }
 0x1c8   :  { %v297_v61 = vrot.slane %v296_v60, 4 }
 0x1ca   :  { %v298_v62 = vadd.f32 %v297_v61, %v296_v60 }
 0x1cc   :  { %v299_v63 = vrot.slane %v298_v62, 2 }
 0x1ce   :  { %v300_v0 = vadd.f32 %v299_v63, %v298_v62 }
 0x1d0   :  { %v301_v1 = vrot.slane %v300_v0, 1 }
 0x1d2   :  { %v302_v3 = vadd.f32 %v301_v1, %v300_v0 }
 0x1d4   :  { %v305_v4 = vadd.f32 %v304_v2, %v302_v3 }
 0x1d6   :  { %306 = vst [vmem:[%s466_s5] sm:$0x1] %v305_v4 }

</bundles_post_ra>
